<compile_context>
chip_gen: v6e
topology: v6e:2x2x1
jax: 0.10.0
libtpu: 0.0.40
codegen_flags: <defaults>
</compile_context>

<pallas_src>
import math

import jax
import jax.numpy as jnp
from jax import lax
from jax.experimental import pallas as pl
from jax.experimental.pallas import tpu as pltpu


# ----------------------------- tiling helpers -----------------------------

_M_TILES = (512, 256, 128, 64, 32, 16, 8)          # sublane-aligned row tiles
_N_TILES = (512, 256, 128)                          # lane-aligned column tiles (head only)
_HEAD_K_TILES = (8192, 4096, 2048, 1024, 512, 256, 128)   # deep-K tiles for the classifier head
# 48 MiB scoped VMEM: safe on v7x (64 MiB physical per TC); v5e/v6e (128 MiB) could raise this.
_VMEM_LIMIT = 48 * 1024 * 1024


def _pick_tile(dim, candidates):
    for c in candidates:
        if c <= dim and dim % c == 0:
            return c
    return dim   # full extent is always a legal block size


def _params(n_parallel, n_arbitrary=0):
    return pltpu.CompilerParams(
        dimension_semantics=("parallel",) * n_parallel + ("arbitrary",) * n_arbitrary,
        vmem_limit_bytes=_VMEM_LIMIT)


def _gelu_new(h):
    # GPT-2 "gelu_new" (tanh approximation), fp32 math
    c = math.sqrt(2.0 / math.pi)
    return 0.5 * h * (1.0 + jnp.tanh(c * (h + 0.044715 * (h * h * h))))


# ----------------------------- Pallas kernels -----------------------------

def _make_ln_matmul_kernel(gelu):
    """Fused LayerNorm prologue + full-N matmul + bias (+ GELU).

    Weight is a resident (K, N) VMEM block; LayerNorm runs once per row block."""
    def kernel(x_ref, g_ref, b_ref, w_ref, bias_ref, o_ref):
        x = x_ref[...].astype(jnp.float32)
        mu = jnp.mean(x, axis=-1, keepdims=True)
        var = jnp.mean((x - mu) ** 2, axis=-1, keepdims=True)
        xn = (x - mu) * lax.rsqrt(var + 1e-5) * g_ref[...] + b_ref[...]
        h = jnp.dot(xn.astype(jnp.bfloat16), w_ref[...],
                    preferred_element_type=jnp.float32) + bias_ref[...]
        if gelu:
            h = _gelu_new(h)
        o_ref[...] = h.astype(o_ref.dtype)
    return kernel


def _make_resident_matmul_kernel(residual):
    """Full-K matmul with a resident (K, N) weight, fused bias (+ residual add)."""
    def kernel(*refs):
        if residual:
            x_ref, w_ref, bias_ref, res_ref, o_ref = refs
        else:
            x_ref, w_ref, bias_ref, o_ref = refs
        h = jnp.dot(x_ref[...], w_ref[...],
                    preferred_element_type=jnp.float32) + bias_ref[...]
        if residual:
            h = h + res_ref[...].astype(jnp.float32)
        o_ref[...] = h.astype(o_ref.dtype)
    return kernel


def _ktiled_matmul_kernel(x_ref, w_ref, bias_ref, o_ref, acc_ref):
    """K-tiled matmul with fp32 accumulator scratch (classifier head: K = S*D is huge)."""
    @pl.when(pl.program_id(2) == 0)
    def _():
        acc_ref[...] = jnp.zeros_like(acc_ref)

    acc_ref[...] += jnp.dot(x_ref[...], w_ref[...],
                            preferred_element_type=jnp.float32)

    @pl.when(pl.program_id(2) == pl.num_programs(2) - 1)
    def _():
        o_ref[...] = (acc_ref[...] + bias_ref[...]).astype(o_ref.dtype)


def _layernorm_kernel(x_ref, g_ref, b_ref, o_ref):
    x = x_ref[...].astype(jnp.float32)
    mu = jnp.mean(x, axis=-1, keepdims=True)
    var = jnp.mean((x - mu) ** 2, axis=-1, keepdims=True)
    o_ref[...] = ((x - mu) * lax.rsqrt(var + 1e-5) * g_ref[...]
                  + b_ref[...]).astype(o_ref.dtype)


def _attention_heads(q, k, v, o_ref, heads, d_head, scale):
    """Shared causal-attention body; writes each head directly into its lane slice of o_ref."""
    S = q.shape[0]
    rows = lax.broadcasted_iota(jnp.int32, (S, S), 0)
    cols = lax.broadcasted_iota(jnp.int32, (S, S), 1)
    causal = rows >= cols
    for h in range(heads):
        sl = slice(h * d_head, (h + 1) * d_head)
        # fold 1/sqrt(Dh) into q (Dh lanes) instead of scaling the [S,S] scores
        qh = (q[:, sl] * scale).astype(q.dtype)
        s = lax.dot_general(qh, k[:, sl], (((1,), (1,)), ((), ())),
                            preferred_element_type=jnp.float32)
        s = jnp.where(causal, s, -1e30)
        m = jnp.max(s, axis=-1, keepdims=True)
        p = jnp.exp(s - m)
        denom = jnp.sum(p, axis=-1, keepdims=True)
        o = jnp.dot(p.astype(v.dtype), v[:, sl], preferred_element_type=jnp.float32)
        o_ref[0, :, sl] = (o * pl.reciprocal(denom, approx=True)).astype(o_ref.dtype)
# TODO(synk): for long sequences convert the attention body to a KV-block-tiled online-softmax
# (flash-style) loop with causal block skipping instead of full [S, S] scores.


def _make_grouped_attention_kernel(heads, d_head, scale):
    """One 128-lane head group per grid step (q/k/v blocks sliced out of packed QKV)."""
    def kernel(q_ref, k_ref, v_ref, o_ref):
        _attention_heads(q_ref[0], k_ref[0], v_ref[0], o_ref, heads, d_head, scale)
    return kernel


def _make_packed_attention_kernel(n_head, d_model, scale):
    """Small-model fallback: whole [S, 3D] slab per batch (D not 128-aligned)."""
    def kernel(qkv_ref, o_ref):
        qkv = qkv_ref[0]
        q = qkv[:, 0:d_model]
        k = qkv[:, d_model:2 * d_model]
        v = qkv[:, 2 * d_model:3 * d_model]
        _attention_heads(q, k, v, o_ref, n_head, d_model // n_head, scale)
    return kernel


# ----------------------------- wrappers -----------------------------

def pallas_ln_matmul(x, g, b, w, bias, gelu=False, out_dtype=jnp.bfloat16):
    M, K = x.shape
    N = w.shape[1]
    tm = _pick_tile(M, _M_TILES)
    return pl.pallas_call(
        _make_ln_matmul_kernel(gelu),
        out_shape=jax.ShapeDtypeStruct((M, N), out_dtype),
        grid=(M // tm,),
        in_specs=[pl.BlockSpec((tm, K), lambda i: (i, 0)),
                  pl.BlockSpec((1, K), lambda i: (0, 0)),
                  pl.BlockSpec((1, K), lambda i: (0, 0)),
                  pl.BlockSpec((K, N), lambda i: (0, 0)),      # resident weight
                  pl.BlockSpec((1, N), lambda i: (0, 0))],
        out_specs=pl.BlockSpec((tm, N), lambda i: (i, 0)),
        compiler_params=_params(1),
    )(x,
      g.reshape(1, K).astype(jnp.float32),
      b.reshape(1, K).astype(jnp.float32),
      w,
      bias.reshape(1, N).astype(jnp.float32))


def pallas_matmul_resident(x, w, bias, residual=None, out_dtype=jnp.bfloat16):
    M, K = x.shape
    N = w.shape[1]
    tm = _pick_tile(M, _M_TILES)
    in_specs = [pl.BlockSpec((tm, K), lambda i: (i, 0)),
                pl.BlockSpec((K, N), lambda i: (0, 0)),         # resident weight
                pl.BlockSpec((1, N), lambda i: (0, 0))]
    args = [x, w, bias.reshape(1, N).astype(jnp.float32)]
    if residual is not None:
        in_specs.append(pl.BlockSpec((tm, N), lambda i: (i, 0)))
        args.append(residual)
    return pl.pallas_call(
        _make_resident_matmul_kernel(residual is not None),
        out_shape=jax.ShapeDtypeStruct((M, N), out_dtype),
        grid=(M // tm,),
        in_specs=in_specs,
        out_specs=pl.BlockSpec((tm, N), lambda i: (i, 0)),
        compiler_params=_params(1),
    )(*args)


def pallas_matmul_ktiled(x, w, bias, out_dtype=jnp.float32):
    """Classifier head: K = S*D is too deep / weight too big for residency -> K-tiled accum."""
    M, K = x.shape
    N = w.shape[1]
    tm = _pick_tile(M, _M_TILES)
    tn = _pick_tile(N, _N_TILES)
    tk = _pick_tile(K, _HEAD_K_TILES)     # large tk amortizes per-grid-step overhead over deep K
    k_steps = K // tk
    w_spec = pl.BlockSpec((tk, tn), lambda i, j, k: (k, j))
    if k_steps > 1:
        try:
            # deeper buffering hides the weight-DMA latency (per-step compute is tiny: M=B rows)
            w_spec = pl.BlockSpec((tk, tn), lambda i, j, k: (k, j),
                                  pipeline_mode=pl.Buffered(3))
        except (TypeError, AttributeError):
            pass
    return pl.pallas_call(
        _ktiled_matmul_kernel,
        out_shape=jax.ShapeDtypeStruct((M, N), out_dtype),
        grid=(M // tm, N // tn, k_steps),
        in_specs=[pl.BlockSpec((tm, tk), lambda i, j, k: (i, k)),
                  w_spec,
                  pl.BlockSpec((1, tn), lambda i, j, k: (0, j))],
        out_specs=pl.BlockSpec((tm, tn), lambda i, j, k: (i, j)),
        scratch_shapes=[pltpu.VMEM((tm, tn), jnp.float32)],
        compiler_params=_params(2, 1),
    )(x, w, bias.reshape(1, N).astype(jnp.float32))


def pallas_layernorm(x, g, b, out_dtype=jnp.bfloat16):
    M, D = x.shape
    tm = _pick_tile(M, _M_TILES)
    return pl.pallas_call(
        _layernorm_kernel,
        out_shape=jax.ShapeDtypeStruct((M, D), out_dtype),
        grid=(M // tm,),
        in_specs=[pl.BlockSpec((tm, D), lambda i: (i, 0)),
                  pl.BlockSpec((1, D), lambda i: (0, 0)),
                  pl.BlockSpec((1, D), lambda i: (0, 0))],
        out_specs=pl.BlockSpec((tm, D), lambda i: (i, 0)),
        compiler_params=_params(1),
    )(x, g.reshape(1, D).astype(jnp.float32), b.reshape(1, D).astype(jnp.float32))


def pallas_attention(qkv, n_head):
    B, S, threeD = qkv.shape
    D = threeD // 3
    Dh = D // n_head
    scale = 1.0 / math.sqrt(Dh)

    if D % 128 == 0 and 128 % Dh == 0:
        # real GPT-2 sizes: grid over (batch, 128-lane head groups); Q/K/V blocks are sliced
        # straight out of the packed [B, S, 3D] slab via three index maps (no reshapes).
        G = D // 128                 # number of 128-lane groups
        hg = 128 // Dh               # heads per group (2 for Dh=64)
        kernel = _make_grouped_attention_kernel(hg, Dh, scale)
        return pl.pallas_call(
            kernel,
            out_shape=jax.ShapeDtypeStruct((B, S, D), qkv.dtype),
            grid=(B, G),
            in_specs=[pl.BlockSpec((1, S, 128), lambda b, g: (b, 0, g)),
                      pl.BlockSpec((1, S, 128), lambda b, g: (b, 0, G + g)),
                      pl.BlockSpec((1, S, 128), lambda b, g: (b, 0, 2 * G + g))],
            out_specs=pl.BlockSpec((1, S, 128), lambda b, g: (b, 0, g)),
            compiler_params=_params(2),
        )(qkv, qkv, qkv)

    # small / non-128-aligned fallback: one batch's full [S, 3D] slab per grid step
    kernel = _make_packed_attention_kernel(n_head, D, scale)
    return pl.pallas_call(
        kernel,
        out_shape=jax.ShapeDtypeStruct((B, S, D), qkv.dtype),
        grid=(B,),
        in_specs=[pl.BlockSpec((1, S, threeD), lambda b: (b, 0, 0))],
        out_specs=pl.BlockSpec((1, S, D), lambda b: (b, 0, 0)),
        compiler_params=_params(1),
    )(qkv)


# ----------------------------- parameters -----------------------------

def init_params(key, *, vocab, hidden, n_layer, n_head, max_seq_len, num_classes):
    # TODO(synk): GPT2Model.from_pretrained('gpt2') weight loading has no in-script
    # equivalent; weights are randomly initialized with the same structure/shapes.
    ks = jax.random.split(key, 4 + n_layer)
    scale = 0.02

    def normal(k, shape):
        return (scale * jax.random.normal(k, shape)).astype(jnp.bfloat16)

    C = num_classes
    Cp = max(128, ((C + 127) // 128) * 128)     # lane-pad the head ONCE at init (not per forward)
    fc1_w = normal(ks[2], (hidden * max_seq_len, C))

    params = {
        "wte": normal(ks[0], (vocab, hidden)),
        "wpe": normal(ks[1], (max_seq_len, hidden)),
        "lnf_g": jnp.ones((hidden,), jnp.float32),
        "lnf_b": jnp.zeros((hidden,), jnp.float32),
        "fc1_w": jnp.pad(fc1_w, ((0, 0), (0, Cp - C))),
        "fc1_b": jnp.zeros((Cp,), jnp.float32),
        "num_classes": C,
        "blocks": [],
    }
    for li in range(n_layer):
        bk = jax.random.split(ks[4 + li], 4)
        params["blocks"].append({
            "ln1_g": jnp.ones((hidden,), jnp.float32),
            "ln1_b": jnp.zeros((hidden,), jnp.float32),
            "attn_w": normal(bk[0], (hidden, 3 * hidden)),
            "attn_b": jnp.zeros((3 * hidden,), jnp.float32),
            "proj_w": normal(bk[1], (hidden, hidden)),
            "proj_b": jnp.zeros((hidden,), jnp.float32),
            "ln2_g": jnp.ones((hidden,), jnp.float32),
            "ln2_b": jnp.zeros((hidden,), jnp.float32),
            "fc_w": normal(bk[2], (hidden, 4 * hidden)),
            "fc_b": jnp.zeros((4 * hidden,), jnp.float32),
            "mlp_proj_w": normal(bk[3], (4 * hidden, hidden)),
            "mlp_proj_b": jnp.zeros((hidden,), jnp.float32),
        })
    return params


# ----------------------------- forward -----------------------------

def gpt2_classifier_forward(params, input_ids, n_head):
    B, S = input_ids.shape
    # embedding gather is glue (plain JAX); the all-ones attention_mask is an additive 0 -> no-op
    h = params["wte"][input_ids] + params["wpe"][jnp.arange(S)]        # [B, S, D] bf16
    D = h.shape[-1]
    x = h.reshape(B * S, D)

    for blk in params["blocks"]:
        # --- self-attention sublayer: LN fused into QKV matmul, residual fused into proj ---
        qkv = pallas_ln_matmul(x, blk["ln1_g"], blk["ln1_b"],
                               blk["attn_w"], blk["attn_b"])            # [B*S, 3D]
        attn = pallas_attention(qkv.reshape(B, S, 3 * D), n_head)       # [B, S, D]
        x = pallas_matmul_resident(attn.reshape(B * S, D), blk["proj_w"], blk["proj_b"],
                                   residual=x)                          # [B*S, D]

        # --- MLP sublayer: LN fused into fc + GELU, residual fused into mlp_proj ---
        hid = pallas_ln_matmul(x, blk["ln2_g"], blk["ln2_b"],
                               blk["fc_w"], blk["fc_b"], gelu=True)     # [B*S, 4D]
        x = pallas_matmul_resident(hid, blk["mlp_proj_w"], blk["mlp_proj_b"], residual=x)

    x = pallas_layernorm(x, params["lnf_g"], params["lnf_b"])           # [B*S, D]
    gpt_out = x.reshape(B, S * D)                                       # == .view(B, -1), row-major

    logits = pallas_matmul_ktiled(gpt_out, params["fc1_w"], params["fc1_b"],
                                  out_dtype=jnp.float32)                # [B, Cp]
    return logits[:, :params["num_classes"]]


# ----------------------------- main -----------------------------

if __name__ == "__main__":
    # small GPT-2-style config (same structure as GPT2Model, scaled down)
    VOCAB = 64
    HIDDEN = 32
    N_LAYER = 2
    N_HEAD = 4
    MAX_SEQ_LEN = 8
    NUM_CLASSES = 3
    BATCH = 2

    key = jax.random.PRNGKey(0)
    k_param, k_ids = jax.random.split(key)

    params = init_params(k_param, vocab=VOCAB, hidden=HIDDEN, n_layer=N_LAYER,
                         n_head=N_HEAD, max_seq_len=MAX_SEQ_LEN,
                         num_classes=NUM_CLASSES)

    input_ids = jax.random.randint(k_ids, (BATCH, MAX_SEQ_LEN), 0, VOCAB, dtype=jnp.int32)

    logits = gpt2_classifier_forward(params, input_ids, N_HEAD)
    jax.block_until_ready(logits)
    assert logits.shape == (BATCH, NUM_CLASSES)
    print("KERNEL_OK")
</pallas_src>

<mosaic_0001>
module attributes {stable_mosaic.version = 11 : i64} {
  func.func @kernel(%arg0: i32, %arg1: memref<16x32xbf16, #tpu.memory_space<vmem>>, %arg2: memref<1x32xf32, #tpu.memory_space<vmem>>, %arg3: memref<1x32xf32, #tpu.memory_space<vmem>>, %arg4: memref<32x96xbf16, #tpu.memory_space<vmem>>, %arg5: memref<1x96xf32, #tpu.memory_space<vmem>>, %arg6: memref<16x96xbf16, #tpu.memory_space<vmem>>) attributes {dimension_semantics = [#tpu.dimension_semantics<parallel>], iteration_bounds = array<i64: 1>, scalar_prefetch = 0 : i64, scratch_operands = 0 : i64, tpu.core_type = #tpu.core_type<tc>, window_params = [{transform_indices = @transform_0, window_bounds = array<i64: 16, 32>}, {pipeline_mode = #tpu.pipeline_mode<synchronous>, transform_indices = @transform_1, window_bounds = array<i64: 1, 32>}, {pipeline_mode = #tpu.pipeline_mode<synchronous>, transform_indices = @transform_2, window_bounds = array<i64: 1, 32>}, {pipeline_mode = #tpu.pipeline_mode<synchronous>, transform_indices = @transform_3, window_bounds = array<i64: 32, 96>}, {pipeline_mode = #tpu.pipeline_mode<synchronous>, transform_indices = @transform_4, window_bounds = array<i64: 1, 96>}, {transform_indices = @transform_5, window_bounds = array<i64: 16, 96>}]} {
    %c0 = arith.constant 0 : index
    %c0_0 = arith.constant 0 : index
    %0 = vector.load %arg1[%c0, %c0_0] : memref<16x32xbf16, #tpu.memory_space<vmem>>, vector<16x32xbf16>
    %1 = arith.extf %0 : vector<16x32xbf16> to vector<16x32xf32>
    %cst = arith.constant dense<0.000000e+00> : vector<16xf32>
    %2 = vector.multi_reduction <add>, %1, %cst [1] : vector<16x32xf32> to vector<16xf32>
    %3 = vector.shape_cast %2 : vector<16xf32> to vector<16x1xf32>
    %cst_1 = arith.constant 3.200000e+01 : f32
    %4 = vector.broadcast %cst_1 : f32 to vector<16x1xf32>
    %5 = arith.divf %3, %4 : vector<16x1xf32>
    %6 = vector.broadcast %5 : vector<16x1xf32> to vector<16x32xf32>
    %7 = arith.subf %1, %6 : vector<16x32xf32>
    %8 = arith.mulf %7, %7 : vector<16x32xf32>
    %cst_2 = arith.constant dense<0.000000e+00> : vector<16xf32>
    %9 = vector.multi_reduction <add>, %8, %cst_2 [1] : vector<16x32xf32> to vector<16xf32>
    %10 = vector.shape_cast %9 : vector<16xf32> to vector<16x1xf32>
    %cst_3 = arith.constant 3.200000e+01 : f32
    %11 = vector.broadcast %cst_3 : f32 to vector<16x1xf32>
    %12 = arith.divf %10, %11 : vector<16x1xf32>
    %13 = vector.broadcast %5 : vector<16x1xf32> to vector<16x32xf32>
    %14 = arith.subf %1, %13 : vector<16x32xf32>
    %cst_4 = arith.constant 9.99999974E-6 : f32
    %15 = vector.broadcast %cst_4 : f32 to vector<16x1xf32>
    %16 = arith.addf %12, %15 : vector<16x1xf32>
    %17 = math.rsqrt %16 : vector<16x1xf32>
    %18 = vector.broadcast %17 : vector<16x1xf32> to vector<16x32xf32>
    %19 = arith.mulf %14, %18 : vector<16x32xf32>
    %c0_5 = arith.constant 0 : index
    %c0_6 = arith.constant 0 : index
    %20 = vector.load %arg2[%c0_5, %c0_6] : memref<1x32xf32, #tpu.memory_space<vmem>>, vector<1x32xf32>
    %21 = vector.broadcast %20 : vector<1x32xf32> to vector<16x32xf32>
    %22 = arith.mulf %19, %21 : vector<16x32xf32>
    %c0_7 = arith.constant 0 : index
    %c0_8 = arith.constant 0 : index
    %23 = vector.load %arg3[%c0_7, %c0_8] : memref<1x32xf32, #tpu.memory_space<vmem>>, vector<1x32xf32>
    %24 = vector.broadcast %23 : vector<1x32xf32> to vector<16x32xf32>
    %25 = arith.addf %22, %24 : vector<16x32xf32>
    %26 = arith.truncf %25 : vector<16x32xf32> to vector<16x32xbf16>
    %c0_9 = arith.constant 0 : index
    %c0_10 = arith.constant 0 : index
    %27 = vector.load %arg4[%c0_9, %c0_10] : memref<32x96xbf16, #tpu.memory_space<vmem>>, vector<32x96xbf16>
    %cst_11 = arith.constant dense<0.000000e+00> : vector<16x96xf32>
    %28 = tpu.matmul %26, %27, %cst_11 {dimension_numbers = #tpu.dot_dimension_numbers<[1], [0], [0], [1], [0, 0, 1, 1], [], []>} : vector<16x32xbf16>, vector<32x96xbf16>, vector<16x96xf32> -> vector<16x96xf32>
    %c0_12 = arith.constant 0 : index
    %c0_13 = arith.constant 0 : index
    %29 = vector.load %arg5[%c0_12, %c0_13] : memref<1x96xf32, #tpu.memory_space<vmem>>, vector<1x96xf32>
    %30 = vector.broadcast %29 : vector<1x96xf32> to vector<16x96xf32>
    %31 = arith.addf %28, %30 : vector<16x96xf32>
    %32 = arith.truncf %31 : vector<16x96xf32> to vector<16x96xbf16>
    %c0_14 = arith.constant 0 : index
    %c0_15 = arith.constant 0 : index
    %33 = vector.load %arg6[%c0_14, %c0_15] : memref<16x96xbf16, #tpu.memory_space<vmem>>, vector<16x96xbf16>
    tpu.vector_store %arg6[%c0_14, %c0_15], %32 {strides = array<i32>} : memref<16x96xbf16, #tpu.memory_space<vmem>>, vector<16x96xbf16>,
    return
  }
  func.func @transform_0(%arg0: i32) -> (i32, i32) {
    %c0_i32 = arith.constant 0 : i32
    %c0_i32_0 = arith.constant 0 : i32
    return %arg0, %c0_i32 : i32, i32
  }
  func.func @transform_1(%arg0: i32) -> (i32, i32) {
    %c0_i32 = arith.constant 0 : i32
    %c0_i32_0 = arith.constant 0 : i32
    %c0_i32_1 = arith.constant 0 : i32
    return %c0_i32, %c0_i32_0 : i32, i32
  }
  func.func @transform_2(%arg0: i32) -> (i32, i32) {
    %c0_i32 = arith.constant 0 : i32
    %c0_i32_0 = arith.constant 0 : i32
    %c0_i32_1 = arith.constant 0 : i32
    return %c0_i32, %c0_i32_0 : i32, i32
  }
  func.func @transform_3(%arg0: i32) -> (i32, i32) {
    %c0_i32 = arith.constant 0 : i32
    %c0_i32_0 = arith.constant 0 : i32
    %c0_i32_1 = arith.constant 0 : i32
    return %c0_i32, %c0_i32_0 : i32, i32
  }
  func.func @transform_4(%arg0: i32) -> (i32, i32) {
    %c0_i32 = arith.constant 0 : i32
    %c0_i32_0 = arith.constant 0 : i32
    %c0_i32_1 = arith.constant 0 : i32
    return %c0_i32, %c0_i32_0 : i32, i32
  }
  func.func @transform_5(%arg0: i32) -> (i32, i32) {
    %c0_i32 = arith.constant 0 : i32
    %c0_i32_0 = arith.constant 0 : i32
    return %arg0, %c0_i32 : i32, i32
  }
}

</mosaic_0001>

<bundles_post_ra>
// kernel: tpu_custom_call.1
= control target key start
LH: loop header
LB: loop body
LE: loop exit
PB: predicated region body
PF: predicated region fallthrough
CT: control target
= control target key end

     0   :  { %10 = vsyncpa [#allocation3], 0  ;;  %s370_s0 = inlined_call_operand.hbm [shape: bf16[16,32], index: 0, kind: input, shape index: {}]   ;;  %s371_s1 = inlined_call_operand.vmem [shape: f32[1,32], index: 1, kind: input, shape index: {}]   ;;  %s372_s2 = inlined_call_operand.vmem [shape: f32[1,32], index: 2, kind: input, shape index: {}]   ;;  %s373_s3 = inlined_call_operand.hbm [shape: bf16[32,96], index: 3, kind: input, shape index: {}]   ;;  %s374_s4 = inlined_call_operand.vmem [shape: f32[1,96], index: 4, kind: input, shape index: {}]   ;;  %s375_s5 = inlined_call_operand.hbm [shape: bf16[16,96], index: 5, kind: output, shape index: {}]  }
   0x1   :  { %11 = vsyncpa [#allocation6], 0 }
   0x2   :  { %12 = vsyncpa [#allocation4], 0  ;;  %s301_s18 = smov [#allocation2]  }
   0x3   :  { %s18_s19 = sshll.u32 %s301_s18, 4  ;;  %s19_s19 = int_to_ptr.vmem [resolvable:$true] %s18_s19 }
   0x4   :  { %s243_s20 = scalar_lea.vmem %s19_s19, 128  ;;  %p248_p1 = scmp.lt.s32.totalorder %s19_s19, %s19_s19 }
   0x5   :  { %p244_p0 = scmp.ne.s32.totalorder %s19_s19, %s243_s20  ;;  %p249_p2 = scmp.lt.s32.totalorder %s243_s20, %s243_s20 }
   0x7   :  { %p250_p3 = por %p249_p2, %p248_p1 }
   0x9   :  { %p251_p4 = pnand %p250_p3, %p244_p0 }
   0xb   :  { %254 = shalt.err (!%p251_p4)
}
   0xc   :  { %s302_s21 = smov 64   ;;  %s303_s22 = smov 4  }
   0xd   :  { %24 = dma.hbm_to_vmem [thread:$0]  %s370_s0, 128, %s19_s19, [#allocation3], %s302_s21, %s302_s21, %s303_s22  }
   0xe   :  { %s304_s25 = smov [#allocation5]  }
   0xf   :  { %s34_s26 = sshll.u32 %s304_s25, 4  ;;  %s35_s26 = int_to_ptr.vmem [resolvable:$true] %s34_s26 }
  0x10   :  { %s263_s27 = scalar_lea.vmem %s35_s26, 256  ;;  %p268_p6 = scmp.lt.s32.totalorder %s35_s26, %s35_s26 }
  0x11   :  { %p264_p5 = scmp.ne.s32.totalorder %s35_s26, %s263_s27  ;;  %p269_p7 = scmp.lt.s32.totalorder %s263_s27, %s263_s27 }
  0x13   :  { %p270_p8 = por %p269_p7, %p268_p6 }
  0x15   :  { %p271_p9 = pnand %p270_p8, %p264_p5 }
  0x17   :  { %274 = shalt.err (!%p271_p9)
}
  0x18   :  { %40 = dma.hbm_to_vmem [thread:$0]  %s373_s3, 256, %s35_s26, [#allocation6], %s302_s21, %s302_s21, %s303_s22  }
  0x19   :  { %295 = dma.done.wait [#allocation3], 128  }
  0x1a   :  { %296 = vsyncadd [#allocation3], 4294967168 }
  0x1b   :  { %297 = dma.done.wait [#allocation6], 256  }
  0x1c   :  { %298 = vsyncadd [#allocation6], 4294967040  ;;  %v208_v0 = vld [vmem:[#allocation2] sm:$0xff]   ;;  %vm54_vm0 = vcmask 261120   ;;  %v229_v15 = vld [vmem:[#allocation5 + $0x8] sm:$0xff]   ;;  %v305_v16 = vmov 0.0  }
  0x1d   :  { %v209_v1 = vunpack.c.l.bf16 %v208_v0  ;;  %v210_v2 = vunpack.c.h.bf16 %v208_v0  ;;  %214 = vmatprep.subr.bf16.mxu0 %v305_v16  ;;  %vm306_vm1 = vmmov 0   ;;  %v230_v17 = vld [vmem:[#allocation5] sm:$0xff]   ;;  %v197_v26 = vld [vmem:[%s371_s1] ss:$0 sm:$0xff]  ;;  %vm176_vm2 = vcmask 781312   ;;  %s307_s1 = smov [#allocation7]  }
  0x1e   :  { %218 = vmatprep.mubr.msk.bf16.mxu0 %vm306_vm1, %v305_v16  ;;  %215 = vmatpush3.bf16.msra.mxu0 %v229_v15  ;;  %v198_v30 = vld [vmem:[%s372_s2] ss:$0 sm:$0xff]  ;;  %s184_s9 = sshll.u32 %s307_s1, 4  ;;  %s185_s9 = int_to_ptr.vmem [resolvable:$true] %s184_s9 }
  0x1f   :  { %v55_v3 = vsel %vm54_vm0, %v209_v1, 0.0  ;;  %v58_v4 = vsel %vm54_vm0, %v210_v2, 0.0  ;;  %216 = vmatprep.subr.bf16.mxu0 %v305_v16  ;;  %v199_v35 = vld [vmem:[%s374_s4] ss:$0 sm:$0xff]  ;;  %s275_s2 = scalar_lea.vmem %s185_s9, 128  ;;  %p280_p11 = scmp.lt.s32.totalorder %s185_s9, %s185_s9 }
  0x20   :  { %56 = vadd.xlane.f32.xlu0 %v55_v3  ;;  %p276_p10 = scmp.ne.s32.totalorder %s185_s9, %s275_s2  ;;  %p281_p12 = scmp.lt.s32.totalorder %s275_s2, %s275_s2 }
  0x22   :  { %217 = vmatpush3.bf16.msra.mxu0 %v230_v17  ;;  %p282_p13 = por %p281_p12, %p280_p11 }
  0x24   :  { %59 = vadd.xlane.f32.xlu0 %v58_v4  ;;  %p283_p0 = pnand %p282_p13, %p276_p10 }
  0xa9   :  { %v57_v5 = vpop.xlane.xlu0 %56 }
  0xaa   :  { %v62_v6 = vmul.f32 0.03125, %v57_v5 }
  0xac   :  { %v64_v7 = vsub.f32 %v209_v1, %v62_v6 }
  0xad   :  { %v60_v8 = vpop.xlane.xlu0 %59 }
  0xae   :  { %v63_v9 = vmul.f32 0.03125, %v60_v8  ;;  %v66_v10 = vmul.f32 %v64_v7, %v64_v7 }
  0xb0   :  { %v65_v11 = vsub.f32 %v210_v2, %v63_v9  ;;  %v68_v12 = vsel %vm54_vm0, %v66_v10, 0.0 }
  0xb1   :  { %69 = vadd.xlane.f32.xlu1 %v68_v12 }
  0xb2   :  { %v67_v13 = vmul.f32 %v65_v11, %v65_v11 }
  0xb4   :  { %v71_v14 = vsel %vm54_vm0, %v67_v13, 0.0 }
  0xb5   :  { %72 = vadd.xlane.f32.xlu1 %v71_v14 }
 0x13a   :  { %v70_v18 = vpop.xlane.xlu1 %69 }
 0x13b   :  { %v74_v19 = vmul.f32 0.03125, %v70_v18 }
 0x13d   :  { %v76_v20 = vadd.f32 1e-05, %v74_v19 }
 0x13e   :  { %v73_v21 = vpop.xlane.xlu1 %72 }
 0x13f   :  { %231 = vrsqrt.f32 %v76_v20  ;;  %v75_v22 = vmul.f32 0.03125, %v73_v21 }
 0x141   :  { %v77_v23 = vadd.f32 1e-05, %v75_v22 }
 0x143   :  { %233 = vrsqrt.f32 %v77_v23 }
 0x14c   :  { %v232_v24 = vpop.eup %231 }
 0x14d   :  { %v80_v25 = vmul.f32 %v232_v24, %v64_v7 }
 0x14f   :  { %v89_v29 = vmul.f32 %v197_v26, %v80_v25 }
 0x150   :  { %v234_v27 = vpop.eup %233 }
 0x151   :  { %v81_v28 = vmul.f32 %v234_v27, %v65_v11  ;;  %v98_v32 = vadd.f32 %v198_v30, %v89_v29 }
 0x153   :  { %v90_v31 = vmul.f32 %v197_v26, %v81_v28 }
 0x155   :  { %v99_v33 = vadd.f32 %v198_v30, %v90_v31 }
 0x157   :  { %v100_v34 = vpack.c.bf16 %v99_v33, %v98_v32 }
 0x159   :  { %219 = vmatmul.mubr.msk.bf16.vlgmr.msra.gmra.mxu0 %vm54_vm0, %v100_v34 }
 0x219   :  { %v161_v36 = vpop.f32.mrf.mxu0 }
 0x21a   :  { %v162_v37 = vadd.f32 %v199_v35, %v161_v36 }
 0x21b   :  { %v220_v38 = vpop.f32.mrf.mxu0 }
 0x21c   :  { %v205_v39 = vpack.c.bf16 %v162_v37, %v162_v37 }
 0x21d   :  { %v164_v40 = vpop.f32.mrf.mxu0 }
 0x21e   :  { %v165_v41 = vadd.f32 %v199_v35, %v164_v40  ;;  %177 = vst.msk [vmem:[#allocation7] sm:$0xf] %vm176_vm2, %v205_v39 }
 0x21f   :  { %v221_v42 = vpop.f32.mrf.mxu0 }
 0x220   :  { %v206_v43 = vpack.c.bf16 %v165_v41, %v165_v41 }
 0x222   :  { %178 = vst.msk [vmem:[#allocation7 + $0x4] sm:$0xf] %vm176_vm2, %v206_v43 }
 0x223   :  { %286 = shalt.err (!%p283_p0)
}
 0x224   :  { %190 = dma.vmem_to_hbm [thread:$0]  %s185_s9, 128, %s375_s5, [#allocation4], %s302_s21, %s302_s21, %s303_s22  }
 0x225   :  { %299 = dma.done.wait [#allocation4], 128  }
 0x226   :  { %300 = vsyncadd [#allocation4], 4294967168 }
 0x227   :  { %194 = vsyncpa [#allocation3], 1 }
 0x228   :  { %195 = vsyncpa [#allocation6], 1 }
 0x229   :  { %196 = vsyncpa [#allocation4], 1 }

</bundles_post_ra>
